<compile_context>
chip_gen: v7x
topology: tpu7x:2x2x1
jax: 0.10.0
libtpu: 0.0.40
codegen_flags: <defaults>
</compile_context>

<pallas_src>
import functools

import jax
import jax.numpy as jnp
from jax import lax
from jax.experimental import pallas as pl
from jax.experimental.pallas import tpu as pltpu

EPS = 1e-6


def _cdiv(a, b):
    return (a + b - 1) // b


def _round_up(a, b):
    return _cdiv(a, b) * b


def _sublayer_ln_kernel(x_ref, y_ref, g_ref, b_ref, o_ref, *, d_actual, d_padded):
    """Fused: o = x + gamma * (y - mean(y)) / (std(y, ddof=1) + eps) + beta."""
    x = x_ref[...].astype(jnp.float32)
    y = y_ref[...].astype(jnp.float32)

    padded = d_padded != d_actual
    if padded:
        lane = lax.broadcasted_iota(jnp.int32, y.shape, 1)
        valid = lane < d_actual
        y = jnp.where(valid, y, 0.0)

    # mean over the *real* D columns only.
    mean = jnp.sum(y, axis=-1, keepdims=True) * jnp.float32(1.0 / d_actual)
    diff = y - mean
    if padded:
        diff = jnp.where(valid, diff, 0.0)

    # torch.std default is unbiased (ddof=1), matching x.std(-1) in the spec.
    var = jnp.sum(diff * diff, axis=-1, keepdims=True) * jnp.float32(
        1.0 / (d_actual - 1))
    std = jnp.sqrt(var)
    # Per-row reciprocal (exact): the (tm, D) divide becomes a (tm, D) multiply,
    # the reciprocal itself is only (tm, 1).
    inv = pl.reciprocal(std + EPS, approx=False)
    normed = diff * inv * g_ref[...] + b_ref[...]
    # Residual add last; store in the caller's native dtype.
    o_ref[...] = (x + normed).astype(o_ref.dtype)


def _vmem_budgets():
    """(tile_budget_bytes, vmem_limit_bytes), TPU-generation aware."""
    try:
        kind = jax.devices()[0].device_kind.lower()
    except Exception:  # pragma: no cover - fall through to conservative defaults
        kind = ""
    if any(g in kind for g in ("v4", "v5", "v6")):
        # 128 MiB physical VMEM parts: let tiles grow.
        return 64 << 20, 96 << 20
    # v7x (64 MiB VMEM per TC) and unknown parts: stay conservative.
    return 24 << 20, 48 << 20


def _choose_tm(M, D, itemsize_x, itemsize_y, itemsize_out, vmem_tile_budget):
    """Largest 8-aligned row tile whose live (double-buffered) tiles fit VMEM."""
    # x, y inputs and the output are each double-buffered by the pipeline.
    per_row_bytes = D * 2 * (itemsize_x + itemsize_y + itemsize_out)
    max_rows = max(8, vmem_tile_budget // per_row_bytes)
    tm = max(8, (max_rows // 8) * 8)
    # Guarantee >= 4 grid programs when M allows: lets ("parallel",) shard the
    # grid across v7x's 2 TensorCores and keeps the pipeline warm; the extra
    # grid steps are negligible (~0.35 us each) on single-TC v5e/v6e.
    min_programs = 4
    if M > 8 * min_programs:
        tm = min(tm, _round_up(_cdiv(M, min_programs), 8))
    tm = min(tm, _round_up(M, 8))  # never allocate tiles far larger than M
    return max(8, (tm // 8) * 8)


def fused_residual_layernorm(x2d, y2d, gamma, beta, *, tm=None, donate_x=False):
    """x2d, y2d: (M, D); gamma/beta: (D,). Returns x2d + LayerNorm(y2d)."""
    M, D = x2d.shape
    assert D > 1, "unbiased std (ddof=1) is undefined for D == 1"
    Dp = _round_up(D, 128)  # lane-dense feature dim

    tile_budget, vmem_limit = _vmem_budgets()
    if tm is None:
        tm = _choose_tm(M, Dp, x2d.dtype.itemsize, y2d.dtype.itemsize,
                        x2d.dtype.itemsize, tile_budget)

    g2 = gamma.astype(jnp.float32).reshape(1, D)
    b2 = beta.astype(jnp.float32).reshape(1, D)
    if Dp != D:
        # Pad the feature dim to a multiple of 128 so output stores are
        # unmasked lane-dense `vst`s; the kernel masks the padded columns out
        # of the LayerNorm statistics, and we slice them back off below.
        x_in = jnp.pad(x2d, ((0, 0), (0, Dp - D)))
        y_in = jnp.pad(y2d, ((0, 0), (0, Dp - D)))
        g2 = jnp.pad(g2, ((0, 0), (0, Dp - D)))
        b2 = jnp.pad(b2, ((0, 0), (0, Dp - D)))
    else:
        x_in, y_in = x2d, y2d

    kernel = functools.partial(_sublayer_ln_kernel, d_actual=D, d_padded=Dp)

    out = pl.pallas_call(
        kernel,
        out_shape=jax.ShapeDtypeStruct((M, Dp), x2d.dtype),
        grid_spec=pltpu.PrefetchScalarGridSpec(
            num_scalar_prefetch=0,
            grid=(pl.cdiv(M, tm),),          # ragged last block handled by Pallas
            in_specs=[
                pl.BlockSpec((tm, Dp), lambda i: (i, 0)),   # x rows
                pl.BlockSpec((tm, Dp), lambda i: (i, 0)),   # sublayer(x) rows
                pl.BlockSpec((1, Dp), lambda i: (0, 0)),    # gamma (resident)
                pl.BlockSpec((1, Dp), lambda i: (0, 0)),    # beta  (resident)
            ],
            out_specs=pl.BlockSpec((tm, Dp), lambda i: (i, 0)),
        ),
        compiler_params=pltpu.CompilerParams(
            dimension_semantics=("parallel",),   # v7x 2-TC sharding
            vmem_limit_bytes=vmem_limit,
        ),
        input_output_aliases=({0: 0} if donate_x else {}),
    )(x_in, y_in, g2, b2)

    if Dp != D:
        out = out[:, :D]
    return out


def sublayer_connection_forward(x, sublayer_fn, params):
    """Mirror of SublayerConnection.forward: x + dropout(norm(sublayer(x))).

    x: (B, T, D); sublayer_fn: any JAX callable (B,T,D)->(B,T,D);
    params: {'gamma': (D,), 'beta': (D,)}.
    """
    # TODO(synk): when the sublayer ends in a known projection matmul, fold
    #             this residual+LayerNorm into that matmul's epilogue to avoid
    #             the y HBM round-trip; not possible for a generic callable.
    y = sublayer_fn(x)
    B, T, D = x.shape
    out2d = fused_residual_layernorm(
        x.reshape(B * T, D), y.reshape(B * T, D),
        params["gamma"], params["beta"])
    # TODO(synk): nn.Dropout training-mode masking is not implemented; the
    #             kernel assumes inference mode where dropout is identity.
    return out2d.reshape(B, T, D)


def _reference(x, y, gamma, beta):
    mean = jnp.mean(y, axis=-1, keepdims=True)
    std = jnp.std(y, axis=-1, keepdims=True, ddof=1)
    return x + gamma * (y - mean) / (std + EPS) + beta


if __name__ == "__main__":
    key = jax.random.PRNGKey(0)
    k1, k2 = jax.random.split(key)

    # Example injected sublayer (the PyTorch module takes it as a runtime
    # callable); any deterministic JAX function works here.
    def sublayer_fn(t):
        return 0.5 * t + 1.0

    # Case 1: lane-dense d_model (multiple of 128).
    B, T, D = 2, 8, 128
    x = jax.random.normal(k1, (B, T, D), dtype=jnp.float32)
    params = {
        "gamma": jnp.ones((D,), dtype=jnp.float32),
        "beta": jnp.zeros((D,), dtype=jnp.float32),
    }
    out = jax.block_until_ready(sublayer_connection_forward(x, sublayer_fn, params))
    ref = _reference(x, sublayer_fn(x), params["gamma"], params["beta"])
    assert out.shape == (B, T, D)
    assert jnp.allclose(out, ref, atol=1e-5, rtol=1e-5)

    # Case 2: non-multiple-of-128 feature dim -> padded lane-dense path.
    D2 = 100
    x2 = jax.random.normal(k2, (B, T, D2), dtype=jnp.float32)
    params2 = {
        "gamma": jnp.full((D2,), 1.5, dtype=jnp.float32),
        "beta": jnp.full((D2,), -0.25, dtype=jnp.float32),
    }
    out2 = jax.block_until_ready(sublayer_connection_forward(x2, sublayer_fn, params2))
    ref2 = _reference(x2, sublayer_fn(x2), params2["gamma"], params2["beta"])
    assert out2.shape == (B, T, D2)
    assert jnp.allclose(out2, ref2, atol=1e-5, rtol=1e-5)

    print("KERNEL_OK")
</pallas_src>

<mosaic_0001>
module attributes {stable_mosaic.version = 11 : i64} {
  func.func @_sublayer_ln_kernel(%arg0: i32, %arg1: memref<16x128xf32, #tpu.memory_space<vmem>>, %arg2: memref<16x128xf32, #tpu.memory_space<vmem>>, %arg3: memref<1x128xf32, #tpu.memory_space<vmem>>, %arg4: memref<1x128xf32, #tpu.memory_space<vmem>>, %arg5: memref<16x128xf32, #tpu.memory_space<vmem>>) attributes {dimension_semantics = [#tpu.dimension_semantics<parallel>], iteration_bounds = array<i64: 1>, scalar_prefetch = 0 : i64, scratch_operands = 0 : i64, tpu.core_type = #tpu.core_type<tc>, window_params = [{transform_indices = @transform_0, window_bounds = array<i64: 16, 128>}, {transform_indices = @transform_1, window_bounds = array<i64: 16, 128>}, {pipeline_mode = #tpu.pipeline_mode<synchronous>, transform_indices = @transform_2, window_bounds = array<i64: 1, 128>}, {pipeline_mode = #tpu.pipeline_mode<synchronous>, transform_indices = @transform_3, window_bounds = array<i64: 1, 128>}, {transform_indices = @transform_4, window_bounds = array<i64: 16, 128>}]} {
    %c0 = arith.constant 0 : index
    %c0_0 = arith.constant 0 : index
    %0 = vector.load %arg1[%c0, %c0_0] : memref<16x128xf32, #tpu.memory_space<vmem>>, vector<16x128xf32>
    %c0_1 = arith.constant 0 : index
    %c0_2 = arith.constant 0 : index
    %1 = vector.load %arg2[%c0_1, %c0_2] : memref<16x128xf32, #tpu.memory_space<vmem>>, vector<16x128xf32>
    %cst = arith.constant dense<0.000000e+00> : vector<16xf32>
    %2 = vector.multi_reduction <add>, %1, %cst [1] : vector<16x128xf32> to vector<16xf32>
    %3 = vector.shape_cast %2 : vector<16xf32> to vector<16x1xf32>
    %cst_3 = arith.constant 7.812500e-03 : f32
    %4 = vector.broadcast %cst_3 : f32 to vector<16x1xf32>
    %5 = arith.mulf %3, %4 : vector<16x1xf32>
    %6 = vector.broadcast %5 : vector<16x1xf32> to vector<16x128xf32>
    %7 = arith.subf %1, %6 : vector<16x128xf32>
    %8 = arith.mulf %7, %7 : vector<16x128xf32>
    %cst_4 = arith.constant dense<0.000000e+00> : vector<16xf32>
    %9 = vector.multi_reduction <add>, %8, %cst_4 [1] : vector<16x128xf32> to vector<16xf32>
    %10 = vector.shape_cast %9 : vector<16xf32> to vector<16x1xf32>
    %cst_5 = arith.constant 0.00787401571 : f32
    %11 = vector.broadcast %cst_5 : f32 to vector<16x1xf32>
    %12 = arith.mulf %10, %11 : vector<16x1xf32>
    %13 = math.sqrt %12 : vector<16x1xf32>
    %cst_6 = arith.constant 9.99999997E-7 : f32
    %14 = vector.broadcast %cst_6 : f32 to vector<16x1xf32>
    %15 = arith.addf %13, %14 : vector<16x1xf32>
    %16 = tpu.reciprocal %15 : vector<16x1xf32> -> vector<16x1xf32>
    %17 = vector.broadcast %16 : vector<16x1xf32> to vector<16x128xf32>
    %18 = arith.mulf %7, %17 : vector<16x128xf32>
    %c0_7 = arith.constant 0 : index
    %c0_8 = arith.constant 0 : index
    %19 = vector.load %arg3[%c0_7, %c0_8] : memref<1x128xf32, #tpu.memory_space<vmem>>, vector<1x128xf32>
    %20 = vector.broadcast %19 : vector<1x128xf32> to vector<16x128xf32>
    %21 = arith.mulf %18, %20 : vector<16x128xf32>
    %c0_9 = arith.constant 0 : index
    %c0_10 = arith.constant 0 : index
    %22 = vector.load %arg4[%c0_9, %c0_10] : memref<1x128xf32, #tpu.memory_space<vmem>>, vector<1x128xf32>
    %23 = vector.broadcast %22 : vector<1x128xf32> to vector<16x128xf32>
    %24 = arith.addf %21, %23 : vector<16x128xf32>
    %25 = arith.addf %0, %24 : vector<16x128xf32>
    %c0_11 = arith.constant 0 : index
    %c0_12 = arith.constant 0 : index
    %26 = vector.load %arg5[%c0_11, %c0_12] : memref<16x128xf32, #tpu.memory_space<vmem>>, vector<16x128xf32>
    tpu.vector_store %arg5[%c0_11, %c0_12], %25 {strides = array<i32>} : memref<16x128xf32, #tpu.memory_space<vmem>>, vector<16x128xf32>,
    return
  }
  func.func @transform_0(%arg0: i32) -> (i32, i32) {
    %c0_i32 = arith.constant 0 : i32
    %c0_i32_0 = arith.constant 0 : i32
    return %arg0, %c0_i32 : i32, i32
  }
  func.func @transform_1(%arg0: i32) -> (i32, i32) {
    %c0_i32 = arith.constant 0 : i32
    %c0_i32_0 = arith.constant 0 : i32
    return %arg0, %c0_i32 : i32, i32
  }
  func.func @transform_2(%arg0: i32) -> (i32, i32) {
    %c0_i32 = arith.constant 0 : i32
    %c0_i32_0 = arith.constant 0 : i32
    %c0_i32_1 = arith.constant 0 : i32
    return %c0_i32, %c0_i32_0 : i32, i32
  }
  func.func @transform_3(%arg0: i32) -> (i32, i32) {
    %c0_i32 = arith.constant 0 : i32
    %c0_i32_0 = arith.constant 0 : i32
    %c0_i32_1 = arith.constant 0 : i32
    return %c0_i32, %c0_i32_0 : i32, i32
  }
  func.func @transform_4(%arg0: i32) -> (i32, i32) {
    %c0_i32 = arith.constant 0 : i32
    %c0_i32_0 = arith.constant 0 : i32
    return %arg0, %c0_i32 : i32, i32
  }
}

</mosaic_0001>

<bundles_post_ra>
// kernel: tpu_custom_call.1
= control target key start
LH: loop header
LB: loop body
LE: loop exit
PB: predicated region body
PF: predicated region fallthrough
CT: control target
= control target key end

     0   :  { %9 = vsyncpa [#allocation3], 0  ;;  %s294_s0 = inlined_call_operand.hbm [shape: f32[16,128], index: 0, kind: input, shape index: {}]   ;;  %s295_s1 = inlined_call_operand.hbm [shape: f32[16,128], index: 1, kind: input, shape index: {}]   ;;  %s296_s2 = inlined_call_operand.vmem [shape: f32[1,128], index: 2, kind: input, shape index: {}]   ;;  %s297_s3 = inlined_call_operand.vmem [shape: f32[1,128], index: 3, kind: input, shape index: {}]   ;;  %s298_s4 = inlined_call_operand.hbm [shape: f32[16,128], index: 4, kind: output, shape index: {}]  }
   0x1   :  { %10 = vsyncpa [#allocation6], 0 }
   0x2   :  { %11 = vsyncpa [#allocation4], 0  ;;  %s213_s15 = smov [#allocation2]   ;;  %s141_s19 = scalar_lea.hbm %s294_s0, 256 }
   0x3   :  { %s17_s16 = sshll.u32 %s213_s15, 4  ;;  %p142_p0 = scmp.ne.s32.totalorder %s294_s0, %s141_s19  ;;  %s18_s16 = int_to_ptr.vmem [resolvable:$true] %s17_s16 }
   0x4   :  { %p145_p1 = scmp.lt.u32.totalorder %s141_s19, %s294_s0 }
   0x6   :  { %p147_p2 = pnand %p145_p1, %p142_p0 }
   0x8   :  { %150 = shalt.err (!%p147_p2)
}
   0x9   :  { %s151_s24 = scalar_lea.vmem %s18_s16, 256  ;;  %p156_p4 = scmp.lt.s32.totalorder %s18_s16, %s18_s16 }
   0xa   :  { %p152_p3 = scmp.ne.s32.totalorder %s18_s16, %s151_s24  ;;  %p157_p5 = scmp.lt.s32.totalorder %s151_s24, %s151_s24 }
   0xc   :  { %p158_p6 = por %p157_p5, %p156_p4 }
   0xe   :  { %p159_p7 = pnand %p158_p6, %p152_p3 }
  0x10   :  { %162 = shalt.err (!%p159_p7)
}
  0x11   :  { %s214_s25 = smov 128   ;;  %s215_s26 = smov 8  }
  0x12   :  { %23 = dma.hbm_to_vmem [thread:$0]  %s294_s0, 256, %s18_s16, [#allocation3], %s214_s25, %s214_s25, %s215_s26  }
  0x13   :  { %s216_s29 = smov [#allocation5]   ;;  %s163_s7 = scalar_lea.hbm %s295_s1, 256 }
  0x14   :  { %s29_s30 = sshll.u32 %s216_s29, 4  ;;  %p164_p8 = scmp.ne.s32.totalorder %s295_s1, %s163_s7  ;;  %s30_s30 = int_to_ptr.vmem [resolvable:$true] %s29_s30 }
  0x15   :  { %p167_p9 = scmp.lt.u32.totalorder %s163_s7, %s295_s1 }
  0x17   :  { %p169_p10 = pnand %p167_p9, %p164_p8 }
  0x19   :  { %172 = shalt.err (!%p169_p10)
}
  0x1a   :  { %s173_s12 = scalar_lea.vmem %s30_s30, 256  ;;  %p178_p12 = scmp.lt.s32.totalorder %s30_s30, %s30_s30 }
  0x1b   :  { %p174_p11 = scmp.ne.s32.totalorder %s30_s30, %s173_s12  ;;  %p179_p13 = scmp.lt.s32.totalorder %s173_s12, %s173_s12 }
  0x1d   :  { %p180_p0 = por %p179_p13, %p178_p12 }
  0x1f   :  { %p181_p1 = pnand %p180_p0, %p174_p11 }
  0x21   :  { %184 = shalt.err (!%p181_p1)
}
  0x22   :  { %35 = dma.hbm_to_vmem [thread:$0]  %s295_s1, 256, %s30_s30, [#allocation6], %s214_s25, %s214_s25, %s215_s26  }
  0x23   :  { %207 = dma.done.wait [#allocation3], 256  }
  0x24   :  { %208 = vsyncadd [#allocation3], 4294967040 }
  0x25   :  { %209 = dma.done.wait [#allocation6], 256  }
  0x26   :  { %210 = vsyncadd [#allocation6], 4294967040  ;;  %v48_v0 = vld [vmem:[#allocation5] sm:$0xff]  ;;  %v49_v1 = vld [vmem:[#allocation5 + $0x8] sm:$0xff]  ;;  %s217_s17 = smov [#allocation7]  }
  0x27   :  { %50 = vadd.xlane.f32.xlu0 %v48_v0  ;;  %v126_v27 = vld [vmem:[%s296_s2] ss:$0 sm:$0xff]  ;;  %v47_v37 = vld [vmem:[#allocation2 + $0x8] sm:$0xff]  ;;  %s113_s18 = sshll.u32 %s217_s17, 4  ;;  %s114_s18 = int_to_ptr.vmem [resolvable:$true] %s113_s18 }
  0x28   :  { %v127_v29 = vld [vmem:[%s297_s3] ss:$0 sm:$0xff]  ;;  %s185_s2 = scalar_lea.vmem %s114_s18, 256  ;;  %p190_p3 = scmp.lt.s32.totalorder %s114_s18, %s114_s18 }
  0x29   :  { %v46_v32 = vld [vmem:[#allocation2] sm:$0xff]  ;;  %p186_p2 = scmp.ne.s32.totalorder %s114_s18, %s185_s2  ;;  %p191_p4 = scmp.lt.s32.totalorder %s185_s2, %s185_s2 }
  0x2b   :  { %52 = vadd.xlane.f32.xlu0 %v49_v1  ;;  %p192_p5 = por %p191_p4, %p190_p3 }
  0x2d   :  { %p193_p6 = pnand %p192_p5, %p186_p2 }
  0xb4   :  { %v51_v2 = vpop.xlane.xlu0 %50 }
  0xb5   :  { %v54_v3 = vmul.f32 0.0078125, %v51_v2 }
  0xb7   :  { %v56_v4 = vsub.f32 %v48_v0, %v54_v3 }
  0xb8   :  { %v53_v5 = vpop.xlane.xlu0 %52 }
  0xb9   :  { %v55_v6 = vmul.f32 0.0078125, %v53_v5  ;;  %v58_v7 = vmul.f32 %v56_v4, %v56_v4 }
  0xbb   :  { %v57_v8 = vsub.f32 %v49_v1, %v55_v6  ;;  %60 = vadd.xlane.f32.xlu1 %v58_v7 }
  0xbd   :  { %v59_v9 = vmul.f32 %v57_v8, %v57_v8 }
  0xbf   :  { %62 = vadd.xlane.f32.xlu1 %v59_v9 }
 0x148   :  { %v61_v10 = vpop.xlane.xlu1 %60 }
 0x149   :  { %v64_v11 = vmul.f32 0.007874016, %v61_v10 }
 0x14b   :  { %133 = vrsqrt.f32 %v64_v11  ;;  %vm68_vm0 = vcmp.eq.f32.partialorder %v64_v11, inf  ;;  %v71_v16 = vand.u32 2147483648, %v64_v11  ;;  %vm70_vm1 = vcmp.eq.f32.partialorder %v64_v11, 0.0 }
 0x14c   :  { %v63_v12 = vpop.xlane.xlu1 %62 }
 0x14d   :  { %v65_v13 = vmul.f32 0.007874016, %v63_v12 }
 0x14f   :  { %135 = vrsqrt.f32 %v65_v13  ;;  %vm75_vm2 = vcmp.eq.f32.partialorder %v65_v13, inf  ;;  %v78_v22 = vand.u32 2147483648, %v65_v13  ;;  %vm77_vm3 = vcmp.eq.f32.partialorder %v65_v13, 0.0 }
 0x155   :  { %v134_v14 = vpop.eup %133 }
 0x156   :  { %v67_v15 = vmul.f32 %v134_v14, %v64_v11 }
 0x158   :  { %v69_v17 = vsel %vm68_vm0, %v64_v11, %v67_v15 }
 0x159   :  { %v136_v18 = vpop.eup %135  ;;  %v72_v19 = vsel %vm70_vm1, %v71_v16, %v69_v17 }
 0x15a   :  { %v80_v20 = vadd.f32 1e-06, %v72_v19  ;;  %v74_v21 = vmul.f32 %v136_v18, %v65_v13 }
 0x15c   :  { %137 = vrcp.f32 %v80_v20  ;;  %v76_v23 = vsel %vm75_vm2, %v65_v13, %v74_v21 }
 0x15d   :  { %v79_v24 = vsel %vm77_vm3, %v78_v22, %v76_v23 }
 0x15e   :  { %v81_v25 = vadd.f32 1e-06, %v79_v24 }
 0x160   :  { %139 = vrcp.f32 %v81_v25 }
 0x166   :  { %v138_v26 = vpop.eup %137 }
 0x167   :  { %v84_v28 = vmul.f32 %v138_v26, %v56_v4 }
 0x169   :  { %v93_v30 = vmul.f32 %v126_v27, %v84_v28 }
 0x16a   :  { %v140_v31 = vpop.eup %139 }
 0x16b   :  { %v85_v33 = vmul.f32 %v140_v31, %v57_v8  ;;  %v102_v34 = vadd.f32 %v127_v29, %v93_v30 }
 0x16d   :  { %v94_v35 = vmul.f32 %v126_v27, %v85_v33  ;;  %v104_v36 = vadd.f32 %v102_v34, %v46_v32 }
 0x16f   :  { %v103_v38 = vadd.f32 %v127_v29, %v94_v35  ;;  %106 = vst [vmem:[#allocation7] sm:$0xff] %v104_v36 }
 0x171   :  { %v105_v39 = vadd.f32 %v103_v38, %v47_v37 }
 0x173   :  { %107 = vst [vmem:[#allocation7 + $0x8] sm:$0xff] %v105_v39 }
 0x174   :  { %196 = shalt.err (!%p193_p6)
}
 0x175   :  { %s197_s20 = scalar_lea.hbm %s298_s4, 256 }
 0x176   :  { %p198_p7 = scmp.ne.s32.totalorder %s298_s4, %s197_s20  ;;  %p201_p8 = scmp.lt.u32.totalorder %s197_s20, %s298_s4 }
 0x178   :  { %p203_p9 = pnand %p201_p8, %p198_p7 }
 0x17a   :  { %206 = shalt.err (!%p203_p9)
}
 0x17b   :  { %119 = dma.vmem_to_hbm [thread:$0]  %s114_s18, 256, %s298_s4, [#allocation4], %s214_s25, %s214_s25, %s215_s26  }
 0x17c   :  { %211 = dma.done.wait [#allocation4], 256  }
 0x17d   :  { %212 = vsyncadd [#allocation4], 4294967040 }
 0x17e   :  { %123 = vsyncpa [#allocation3], 1 }
 0x17f   :  { %124 = vsyncpa [#allocation6], 1 }
 0x180   :  { %125 = vsyncpa [#allocation4], 1 }

</bundles_post_ra>
